<compile_context>
chip_gen: v7x
topology: tpu7x:2x2x1
jax: 0.10.0
libtpu: 0.0.40
codegen_flags: <defaults>
</compile_context>

<pallas_src>
import functools

import jax
import jax.numpy as jnp
from jax.experimental import pallas as pl
from jax.experimental.pallas import tpu as pltpu

EPS = 1e-5


# ----------------------------------------------------------------------------
# small helpers
# ----------------------------------------------------------------------------
def _round_up(n, m):
    return ((n + m - 1) // m) * m


def _pad2(a, rows, cols):
    return jnp.pad(a, ((0, rows - a.shape[0]), (0, cols - a.shape[1])))


def _pad_row(a, cols):
    a = a.reshape(1, -1)
    return jnp.pad(a, ((0, 0), (0, cols - a.shape[1])))


def _tpu_vmem_capacity_bytes(default=64 << 20):
    """Physical VMEM per core (v7x: 64 MiB, v5e/v6e: 128 MiB); safe fallback."""
    try:
        cap = getattr(pltpu.get_tpu_info(), "vmem_capacity_bytes", None)
        if cap:
            return int(cap)
    except Exception:
        pass
    return default


def _suggested_lane(max_width):
    """128 on v5e / narrow layers; 256 on 256-wide-MXU chips with wide layers."""
    if max_width < 256:
        return 128
    try:
        info = pltpu.get_tpu_info()
        for attr in ("mxu_size", "mxu_width", "mxu_column_count",
                     "mxu_contracting_size"):
            v = getattr(info, attr, None)
            if v is not None and int(v) >= 256:
                return 256
    except Exception:
        pass
    return 128


# ----------------------------------------------------------------------------
# fused kernel: whole MLP forward for one complete BN batch per grid step
# ----------------------------------------------------------------------------
def _fused_mlp_kernel(n_hidden, *refs):
    """refs = (x, [w_i, gamma_i, beta_i]*n_hidden, w_final, b_final, out)."""
    x_ref = refs[0]
    o_ref = refs[-1]

    x = x_ref[0]                              # (B, ninput) f32, one full BN batch
    inv_n = 1.0 / x.shape[0]

    idx = 1
    for _ in range(n_hidden):
        w_ref, g_ref, beta_ref = refs[idx], refs[idx + 1], refs[idx + 2]
        idx += 3

        # Linear (hidden bias omitted: exactly cancels under batch-stat BN).
        # bf16 operands feed the MXU; accumulate in f32.
        h = jnp.dot(x.astype(jnp.bfloat16), w_ref[...],
                    preferred_element_type=jnp.float32)

        # BatchNorm1d, training mode, biased batch variance — two-pass stats
        # (centered variance avoids the E[h^2]-E[h]^2 cancellation issue).
        mean = jnp.sum(h, axis=0, keepdims=True) * inv_n
        hc = h - mean
        var = jnp.sum(hc * hc, axis=0, keepdims=True) * inv_n
        scale = g_ref[...] * jax.lax.rsqrt(var + EPS)        # rsqrt -> EUP slot

        # BN affine + ReLU fused as scale/shift + max.  Padded columns stay 0
        # (gamma/beta padding is 0, hc is 0 there).
        x = jnp.maximum(hc * scale + beta_ref[...], 0.0)

    # Final plain Linear (bias kept).
    w_f_ref, b_f_ref = refs[idx], refs[idx + 1]
    out = jnp.dot(x.astype(jnp.bfloat16), w_f_ref[...],
                  preferred_element_type=jnp.float32) + b_f_ref[...]
    o_ref[0] = out.astype(o_ref.dtype)


# ----------------------------------------------------------------------------
# parameter init (matches MLP_I.init_weights) + ONE-TIME kernel-layout prep
# ----------------------------------------------------------------------------
def init_mlp_i_params(key, ninput, noutput, layers_str, init_std=0.02):
    """Logical params.  Hidden Linear biases are 0 at init and mathematically
    redundant before batch-stat BN, so they are not stored at all."""
    layer_sizes = [ninput] + [int(s) for s in layers_str.split('-')]
    hidden = []
    for i in range(len(layer_sizes) - 1):
        fan_in, fan_out = layer_sizes[i], layer_sizes[i + 1]
        key, k_w, k_g = jax.random.split(key, 3)
        w = init_std * jax.random.normal(k_w, (fan_in, fan_out), jnp.float32)
        gamma = init_std * jax.random.normal(k_g, (fan_out,), jnp.float32)
        beta = jnp.zeros((fan_out,), jnp.float32)
        hidden.append((w, gamma, beta))
    key, k_w = jax.random.split(key)
    w_f = init_std * jax.random.normal(k_w, (layer_sizes[-1], noutput), jnp.float32)
    b_f = jnp.zeros((noutput,), jnp.float32)
    return {"hidden": hidden, "final": (w_f, b_f)}


def prepare_mlp_i_params(params, lane=None):
    """One-time padding + bf16 cast of all weights/BN params.

    Call this ONCE (outside the serving/training loop): per forward call the
    only weight cost is then the kernel's own input DMA.
    """
    hidden = params["hidden"]
    w_f, b_f = params["final"]
    ninput = hidden[0][0].shape[0] if hidden else w_f.shape[0]
    noutput = w_f.shape[1]
    widths = [w.shape[1] for (w, _, _) in hidden] + [noutput]
    if lane is None:
        lane = _suggested_lane(max(widths))

    flat = []
    hidden_padded_widths = []
    prev = ninput                       # first weight rows stay UNPADDED: K=ninput
    for (w, gamma, beta) in hidden:
        out_p = _round_up(w.shape[1], lane)
        flat.append(_pad2(w, prev, out_p).astype(jnp.bfloat16))     # MXU operand
        flat.append(_pad_row(gamma.astype(jnp.float32), out_p))     # BN params f32
        flat.append(_pad_row(beta.astype(jnp.float32), out_p))
        hidden_padded_widths.append(out_p)
        prev = out_p
    out_p = _round_up(noutput, lane)
    flat.append(_pad2(w_f, prev, out_p).astype(jnp.bfloat16))
    flat.append(_pad_row(b_f.astype(jnp.float32), out_p))

    return {
        "flat": tuple(flat),
        "n_hidden": len(hidden),
        "ninput": ninput,
        "noutput": noutput,
        "out_padded": out_p,
        "hidden_padded": tuple(hidden_padded_widths),
        "lane": lane,
    }


# ----------------------------------------------------------------------------
# forward
# ----------------------------------------------------------------------------
def mlp_i_forward(prepared, x, keep_padded=False):
    """Fused MLP forward.

    x: (B, ninput) for a single BN batch, or (G, B, ninput) for G INDEPENDENT
    BN batches (grid over G: weights stay VMEM-resident across steps; on v7x
    the independent batches shard across both TensorCores).
    """
    squeeze = (x.ndim == 2)
    if squeeze:
        x = x[None]
    G, B, nin = x.shape
    assert nin == prepared["ninput"], "input feature dim mismatch"

    flat = prepared["flat"]
    n_hidden = prepared["n_hidden"]
    out_p = prepared["out_padded"]
    noutput = prepared["noutput"]

    x = x.astype(jnp.float32)

    # ---- BlockSpecs: x/out indexed by the batch-group axis; params constant ----
    in_specs = [pl.BlockSpec((1, B, nin), lambda g: (g, 0, 0))]
    for a in flat:
        in_specs.append(pl.BlockSpec(a.shape, lambda g, _nd=a.ndim: (0,) * _nd))
    out_spec = pl.BlockSpec((1, B, out_p), lambda g: (g, 0, 0))

    # ---- cost estimate (scheduling hint for XLA) ----
    flops = 0
    for i in range(n_hidden):
        w = flat[3 * i]
        flops += 2 * G * B * w.shape[0] * w.shape[1]
    w_last = flat[3 * n_hidden]
    flops += 2 * G * B * w_last.shape[0] * w_last.shape[1]
    bytes_accessed = (x.size * 4
                      + sum(int(a.size) * a.dtype.itemsize for a in flat)
                      + G * B * out_p * 4)
    transcendentals = G * sum(prepared["hidden_padded"])          # rsqrt per BN col

    # ---- explicit VMEM budget (v7x: 64 MiB physical) ----
    weight_bytes = sum(int(a.size) * a.dtype.itemsize for a in flat)
    max_w = max(prepared["hidden_padded"] + (out_p, nin))
    act_bytes = 4 * B * max_w * 4                                  # h/hc/x headroom
    need = (2 * weight_bytes + 2 * (B * nin + B * out_p) * 4
            + act_bytes + (2 << 20))
    vmem_limit = int(min(max(need, 4 << 20),
                         int(0.75 * _tpu_vmem_capacity_bytes())))

    kernel = functools.partial(_fused_mlp_kernel, n_hidden)
    out_padded = pl.pallas_call(
        kernel,
        out_shape=jax.ShapeDtypeStruct((G, B, out_p), jnp.float32),
        grid=(G,),
        in_specs=in_specs,
        out_specs=out_spec,
        compiler_params=pltpu.CompilerParams(
            dimension_semantics=("parallel",),    # independent BN batches
            vmem_limit_bytes=vmem_limit),
        cost_estimate=pl.CostEstimate(flops=flops,
                                      transcendentals=transcendentals,
                                      bytes_accessed=bytes_accessed),
    )(x, *flat)

    out = out_padded if keep_padded else out_padded[:, :, :noutput]
    return out[0] if squeeze else out


# ----------------------------------------------------------------------------
# demo
# ----------------------------------------------------------------------------
if __name__ == "__main__":
    # Shapes consistent with: MLP_I(ninput=32, noutput=16, layers="64-32")
    ninput, noutput, layers_str = 32, 16, "64-32"
    batch = 8

    key = jax.random.PRNGKey(0)
    key, k_x = jax.random.split(key)
    x = jax.random.normal(k_x, (batch, ninput), jnp.float32)

    params = init_mlp_i_params(key, ninput, noutput, layers_str)
    prepared = prepare_mlp_i_params(params)      # ONE-TIME pad + bf16 cast

    # single BN batch
    out = mlp_i_forward(prepared, x)
    jax.block_until_ready(out)
    assert out.shape == (batch, noutput)

    # stacked independent BN batches: weights DMA'd once, grid over batches
    # (shards across both TensorCores on v7x).
    key, k_x3 = jax.random.split(key)
    x3 = jax.random.normal(k_x3, (2, batch, ninput), jnp.float32)
    out3 = mlp_i_forward(prepared, x3)
    jax.block_until_ready(out3)
    assert out3.shape == (2, batch, noutput)

    print("KERNEL_OK")
</pallas_src>

<mosaic_0001>
module attributes {stable_mosaic.version = 11 : i64} {
  func.func @_fused_mlp_kernel(%arg0: i32, %arg1: memref<1x8x32xf32, #tpu.memory_space<vmem>>, %arg2: memref<32x128xbf16, #tpu.memory_space<vmem>>, %arg3: memref<1x128xf32, #tpu.memory_space<vmem>>, %arg4: memref<1x128xf32, #tpu.memory_space<vmem>>, %arg5: memref<128x128xbf16, #tpu.memory_space<vmem>>, %arg6: memref<1x128xf32, #tpu.memory_space<vmem>>, %arg7: memref<1x128xf32, #tpu.memory_space<vmem>>, %arg8: memref<128x128xbf16, #tpu.memory_space<vmem>>, %arg9: memref<1x128xf32, #tpu.memory_space<vmem>>, %arg10: memref<1x8x128xf32, #tpu.memory_space<vmem>>) attributes {dimension_semantics = [#tpu.dimension_semantics<parallel>], iteration_bounds = array<i64: 1>, scalar_prefetch = 0 : i64, scratch_operands = 0 : i64, tpu.core_type = #tpu.core_type<tc>, window_params = [{transform_indices = @transform_0, window_bounds = array<i64: 1, 8, 32>}, {pipeline_mode = #tpu.pipeline_mode<synchronous>, transform_indices = @transform_1, window_bounds = array<i64: 32, 128>}, {pipeline_mode = #tpu.pipeline_mode<synchronous>, transform_indices = @transform_2, window_bounds = array<i64: 1, 128>}, {pipeline_mode = #tpu.pipeline_mode<synchronous>, transform_indices = @transform_3, window_bounds = array<i64: 1, 128>}, {pipeline_mode = #tpu.pipeline_mode<synchronous>, transform_indices = @transform_4, window_bounds = array<i64: 128, 128>}, {pipeline_mode = #tpu.pipeline_mode<synchronous>, transform_indices = @transform_5, window_bounds = array<i64: 1, 128>}, {pipeline_mode = #tpu.pipeline_mode<synchronous>, transform_indices = @transform_6, window_bounds = array<i64: 1, 128>}, {pipeline_mode = #tpu.pipeline_mode<synchronous>, transform_indices = @transform_7, window_bounds = array<i64: 128, 128>}, {pipeline_mode = #tpu.pipeline_mode<synchronous>, transform_indices = @transform_8, window_bounds = array<i64: 1, 128>}, {transform_indices = @transform_9, window_bounds = array<i64: 1, 8, 128>}]} {
    %c0 = arith.constant 0 : index
    %c0_0 = arith.constant 0 : index
    %c0_1 = arith.constant 0 : index
    %0 = vector.load %arg1[%c0, %c0_0, %c0_1] : memref<1x8x32xf32, #tpu.memory_space<vmem>>, vector<1x8x32xf32>
    %1 = vector.shape_cast %0 : vector<1x8x32xf32> to vector<8x32xf32>
    %2 = arith.truncf %1 : vector<8x32xf32> to vector<8x32xbf16>
    %c0_2 = arith.constant 0 : index
    %c0_3 = arith.constant 0 : index
    %3 = vector.load %arg2[%c0_2, %c0_3] : memref<32x128xbf16, #tpu.memory_space<vmem>>, vector<32x128xbf16>
    %cst = arith.constant dense<0.000000e+00> : vector<8x128xf32>
    %4 = tpu.matmul %2, %3, %cst {dimension_numbers = #tpu.dot_dimension_numbers<[1], [0], [0], [1], [0, 0, 1, 1], [], []>} : vector<8x32xbf16>, vector<32x128xbf16>, vector<8x128xf32> -> vector<8x128xf32>
    %cst_4 = arith.constant dense<0.000000e+00> : vector<128xf32>
    %5 = vector.multi_reduction <add>, %4, %cst_4 [0] : vector<8x128xf32> to vector<128xf32>
    %6 = vector.shape_cast %5 : vector<128xf32> to vector<1x128xf32>
    %cst_5 = arith.constant 1.250000e-01 : f32
    %7 = vector.broadcast %cst_5 : f32 to vector<1x128xf32>
    %8 = arith.mulf %6, %7 : vector<1x128xf32>
    %9 = vector.broadcast %8 : vector<1x128xf32> to vector<8x128xf32>
    %10 = arith.subf %4, %9 : vector<8x128xf32>
    %11 = arith.mulf %10, %10 : vector<8x128xf32>
    %cst_6 = arith.constant dense<0.000000e+00> : vector<128xf32>
    %12 = vector.multi_reduction <add>, %11, %cst_6 [0] : vector<8x128xf32> to vector<128xf32>
    %13 = vector.shape_cast %12 : vector<128xf32> to vector<1x128xf32>
    %cst_7 = arith.constant 1.250000e-01 : f32
    %14 = vector.broadcast %cst_7 : f32 to vector<1x128xf32>
    %15 = arith.mulf %13, %14 : vector<1x128xf32>
    %c0_8 = arith.constant 0 : index
    %c0_9 = arith.constant 0 : index
    %16 = vector.load %arg3[%c0_8, %c0_9] : memref<1x128xf32, #tpu.memory_space<vmem>>, vector<1x128xf32>
    %cst_10 = arith.constant 9.99999974E-6 : f32
    %17 = vector.broadcast %cst_10 : f32 to vector<1x128xf32>
    %18 = arith.addf %15, %17 : vector<1x128xf32>
    %19 = math.rsqrt %18 : vector<1x128xf32>
    %20 = arith.mulf %16, %19 : vector<1x128xf32>
    %21 = vector.broadcast %20 : vector<1x128xf32> to vector<8x128xf32>
    %22 = arith.mulf %10, %21 : vector<8x128xf32>
    %c0_11 = arith.constant 0 : index
    %c0_12 = arith.constant 0 : index
    %23 = vector.load %arg4[%c0_11, %c0_12] : memref<1x128xf32, #tpu.memory_space<vmem>>, vector<1x128xf32>
    %24 = vector.broadcast %23 : vector<1x128xf32> to vector<8x128xf32>
    %25 = arith.addf %22, %24 : vector<8x128xf32>
    %cst_13 = arith.constant 0.000000e+00 : f32
    %26 = vector.broadcast %cst_13 : f32 to vector<8x128xf32>
    %27 = arith.maximumf %25, %26 : vector<8x128xf32>
    %28 = arith.truncf %27 : vector<8x128xf32> to vector<8x128xbf16>
    %c0_14 = arith.constant 0 : index
    %c0_15 = arith.constant 0 : index
    %29 = vector.load %arg5[%c0_14, %c0_15] : memref<128x128xbf16, #tpu.memory_space<vmem>>, vector<128x128xbf16>
    %cst_16 = arith.constant dense<0.000000e+00> : vector<8x128xf32>
    %30 = tpu.matmul %28, %29, %cst_16 {dimension_numbers = #tpu.dot_dimension_numbers<[1], [0], [0], [1], [0, 0, 1, 1], [], []>} : vector<8x128xbf16>, vector<128x128xbf16>, vector<8x128xf32> -> vector<8x128xf32>
    %cst_17 = arith.constant dense<0.000000e+00> : vector<128xf32>
    %31 = vector.multi_reduction <add>, %30, %cst_17 [0] : vector<8x128xf32> to vector<128xf32>
    %32 = vector.shape_cast %31 : vector<128xf32> to vector<1x128xf32>
    %cst_18 = arith.constant 1.250000e-01 : f32
    %33 = vector.broadcast %cst_18 : f32 to vector<1x128xf32>
    %34 = arith.mulf %32, %33 : vector<1x128xf32>
    %35 = vector.broadcast %34 : vector<1x128xf32> to vector<8x128xf32>
    %36 = arith.subf %30, %35 : vector<8x128xf32>
    %37 = arith.mulf %36, %36 : vector<8x128xf32>
    %cst_19 = arith.constant dense<0.000000e+00> : vector<128xf32>
    %38 = vector.multi_reduction <add>, %37, %cst_19 [0] : vector<8x128xf32> to vector<128xf32>
    %39 = vector.shape_cast %38 : vector<128xf32> to vector<1x128xf32>
    %cst_20 = arith.constant 1.250000e-01 : f32
    %40 = vector.broadcast %cst_20 : f32 to vector<1x128xf32>
    %41 = arith.mulf %39, %40 : vector<1x128xf32>
    %c0_21 = arith.constant 0 : index
    %c0_22 = arith.constant 0 : index
    %42 = vector.load %arg6[%c0_21, %c0_22] : memref<1x128xf32, #tpu.memory_space<vmem>>, vector<1x128xf32>
    %cst_23 = arith.constant 9.99999974E-6 : f32
    %43 = vector.broadcast %cst_23 : f32 to vector<1x128xf32>
    %44 = arith.addf %41, %43 : vector<1x128xf32>
    %45 = math.rsqrt %44 : vector<1x128xf32>
    %46 = arith.mulf %42, %45 : vector<1x128xf32>
    %47 = vector.broadcast %46 : vector<1x128xf32> to vector<8x128xf32>
    %48 = arith.mulf %36, %47 : vector<8x128xf32>
    %c0_24 = arith.constant 0 : index
    %c0_25 = arith.constant 0 : index
    %49 = vector.load %arg7[%c0_24, %c0_25] : memref<1x128xf32, #tpu.memory_space<vmem>>, vector<1x128xf32>
    %50 = vector.broadcast %49 : vector<1x128xf32> to vector<8x128xf32>
    %51 = arith.addf %48, %50 : vector<8x128xf32>
    %cst_26 = arith.constant 0.000000e+00 : f32
    %52 = vector.broadcast %cst_26 : f32 to vector<8x128xf32>
    %53 = arith.maximumf %51, %52 : vector<8x128xf32>
    %54 = arith.truncf %53 : vector<8x128xf32> to vector<8x128xbf16>
    %c0_27 = arith.constant 0 : index
    %c0_28 = arith.constant 0 : index
    %55 = vector.load %arg8[%c0_27, %c0_28] : memref<128x128xbf16, #tpu.memory_space<vmem>>, vector<128x128xbf16>
    %cst_29 = arith.constant dense<0.000000e+00> : vector<8x128xf32>
    %56 = tpu.matmul %54, %55, %cst_29 {dimension_numbers = #tpu.dot_dimension_numbers<[1], [0], [0], [1], [0, 0, 1, 1], [], []>} : vector<8x128xbf16>, vector<128x128xbf16>, vector<8x128xf32> -> vector<8x128xf32>
    %c0_30 = arith.constant 0 : index
    %c0_31 = arith.constant 0 : index
    %57 = vector.load %arg9[%c0_30, %c0_31] : memref<1x128xf32, #tpu.memory_space<vmem>>, vector<1x128xf32>
    %58 = vector.broadcast %57 : vector<1x128xf32> to vector<8x128xf32>
    %59 = arith.addf %56, %58 : vector<8x128xf32>
    %c0_32 = arith.constant 0 : index
    %c0_33 = arith.constant 0 : index
    %c0_34 = arith.constant 0 : index
    %60 = vector.load %arg10[%c0_32, %c0_33, %c0_34] : memref<1x8x128xf32, #tpu.memory_space<vmem>>, vector<1x8x128xf32>
    %61 = vector.shape_cast %60 : vector<1x8x128xf32> to vector<8x128xf32>
    %62 = vector.shape_cast %59 : vector<8x128xf32> to vector<1x8x128xf32>
    tpu.vector_store %arg10[%c0_32, %c0_33, %c0_34], %62 {strides = array<i32>} : memref<1x8x128xf32, #tpu.memory_space<vmem>>, vector<1x8x128xf32>,
    return
  }
  func.func @transform_0(%arg0: i32) -> (i32, i32, i32) {
    %c0_i32 = arith.constant 0 : i32
    %c0_i32_0 = arith.constant 0 : i32
    %c0_i32_1 = arith.constant 0 : i32
    return %arg0, %c0_i32, %c0_i32_0 : i32, i32, i32
  }
  func.func @transform_1(%arg0: i32) -> (i32, i32) {
    %c0_i32 = arith.constant 0 : i32
    %c0_i32_0 = arith.constant 0 : i32
    %c0_i32_1 = arith.constant 0 : i32
    return %c0_i32, %c0_i32_0 : i32, i32
  }
  func.func @transform_2(%arg0: i32) -> (i32, i32) {
    %c0_i32 = arith.constant 0 : i32
    %c0_i32_0 = arith.constant 0 : i32
    %c0_i32_1 = arith.constant 0 : i32
    return %c0_i32, %c0_i32_0 : i32, i32
  }
  func.func @transform_3(%arg0: i32) -> (i32, i32) {
    %c0_i32 = arith.constant 0 : i32
    %c0_i32_0 = arith.constant 0 : i32
    %c0_i32_1 = arith.constant 0 : i32
    return %c0_i32, %c0_i32_0 : i32, i32
  }
  func.func @transform_4(%arg0: i32) -> (i32, i32) {
    %c0_i32 = arith.constant 0 : i32
    %c0_i32_0 = arith.constant 0 : i32
    %c0_i32_1 = arith.constant 0 : i32
    return %c0_i32, %c0_i32_0 : i32, i32
  }
  func.func @transform_5(%arg0: i32) -> (i32, i32) {
    %c0_i32 = arith.constant 0 : i32
    %c0_i32_0 = arith.constant 0 : i32
    %c0_i32_1 = arith.constant 0 : i32
    return %c0_i32, %c0_i32_0 : i32, i32
  }
  func.func @transform_6(%arg0: i32) -> (i32, i32) {
    %c0_i32 = arith.constant 0 : i32
    %c0_i32_0 = arith.constant 0 : i32
    %c0_i32_1 = arith.constant 0 : i32
    return %c0_i32, %c0_i32_0 : i32, i32
  }
  func.func @transform_7(%arg0: i32) -> (i32, i32) {
    %c0_i32 = arith.constant 0 : i32
    %c0_i32_0 = arith.constant 0 : i32
    %c0_i32_1 = arith.constant 0 : i32
    return %c0_i32, %c0_i32_0 : i32, i32
  }
  func.func @transform_8(%arg0: i32) -> (i32, i32) {
    %c0_i32 = arith.constant 0 : i32
    %c0_i32_0 = arith.constant 0 : i32
    %c0_i32_1 = arith.constant 0 : i32
    return %c0_i32, %c0_i32_0 : i32, i32
  }
  func.func @transform_9(%arg0: i32) -> (i32, i32, i32) {
    %c0_i32 = arith.constant 0 : i32
    %c0_i32_0 = arith.constant 0 : i32
    %c0_i32_1 = arith.constant 0 : i32
    return %arg0, %c0_i32, %c0_i32_0 : i32, i32, i32
  }
}

</mosaic_0001>

<bundles_post_ra>
// kernel: tpu_custom_call.1
= control target key start
LH: loop header
LB: loop body
LE: loop exit
PB: predicated region body
PF: predicated region fallthrough
CT: control target
= control target key end

     0   :  { %14 = vsyncpa [#allocation3], 0  ;;  %s860_s0 = inlined_call_operand.hbm [shape: f32[1,8,32], index: 0, kind: input, shape index: {}]   ;;  %s861_s1 = inlined_call_operand.hbm [shape: bf16[32,128], index: 1, kind: input, shape index: {}]   ;;  %s862_s2 = inlined_call_operand.vmem [shape: f32[1,128], index: 2, kind: input, shape index: {}]   ;;  %s863_s3 = inlined_call_operand.vmem [shape: f32[1,128], index: 3, kind: input, shape index: {}]   ;;  %s864_s4 = inlined_call_operand.hbm [shape: bf16[128,128], index: 4, kind: input, shape index: {}]   ;;  %s865_s5 = inlined_call_operand.vmem [shape: f32[1,128], index: 5, kind: input, shape index: {}]   ;;  %s866_s6 = inlined_call_operand.vmem [shape: f32[1,128], index: 6, kind: input, shape index: {}]   ;;  %s867_s7 = inlined_call_operand.hbm [shape: bf16[128,128], index: 7, kind: input, shape index: {}]   ;;  %s868_s8 = inlined_call_operand.vmem [shape: f32[1,128], index: 8, kind: input, shape index: {}]   ;;  %s869_s9 = inlined_call_operand.hbm [shape: f32[1,8,128], index: 9, kind: output, shape index: {}]  }
   0x1   :  { %15 = vsyncpa [#allocation6], 0 }
   0x2   :  { %16 = vsyncpa [#allocation9], 0 }
   0x3   :  { %17 = vsyncpa [#allocation4], 0  ;;  %s696_s30 = smov [#allocation5]   ;;  %s578_s13 = scalar_lea.hbm %s861_s1, 256 }
   0x4   :  { %s33_s10 = sshll.u32 %s696_s30, 4  ;;  %p579_p0 = scmp.ne.s32.totalorder %s861_s1, %s578_s13  ;;  %s34_s10 = int_to_ptr.vmem [resolvable:$true] %s33_s10 }
   0x5   :  { %p582_p1 = scmp.lt.u32.totalorder %s578_s13, %s861_s1 }
   0x7   :  { %p584_p2 = pnand %p582_p1, %p579_p0 }
   0x9   :  { %587 = shalt.err (!%p584_p2)
}
   0xa   :  { %s588_s18 = scalar_lea.vmem %s34_s10, 256  ;;  %p593_p4 = scmp.lt.s32.totalorder %s34_s10, %s34_s10 }
   0xb   :  { %p589_p3 = scmp.ne.s32.totalorder %s34_s10, %s588_s18  ;;  %p594_p5 = scmp.lt.s32.totalorder %s588_s18, %s588_s18 }
   0xd   :  { %p595_p6 = por %p594_p5, %p593_p4 }
   0xf   :  { %p596_p7 = pnand %p595_p6, %p589_p3 }
  0x11   :  { %599 = shalt.err (!%p596_p7)
}
  0x12   :  { %s697_s19 = smov 64   ;;  %s698_s20 = smov 4  }
  0x13   :  { %39 = dma.hbm_to_vmem [thread:$0]  %s861_s1, 256, %s34_s10, [#allocation6], %s697_s19, %s697_s19, %s698_s20  }
  0x14   :  { %s699_s23 = smov [#allocation2]   ;;  %s700_s25 = smov [#allocation7]  }
  0x15   :  { %s24_s24 = sshll.u32 %s699_s23, 4  ;;  %s49_s26 = sshll.u32 %s700_s25, 4  ;;  %s25_s24 = int_to_ptr.vmem [resolvable:$true] %s24_s24  ;;  %s50_s26 = int_to_ptr.vmem [resolvable:$true] %s49_s26 }
  0x16   :  { %s600_s29 = scalar_lea.hbm %s860_s0, 128 }
  0x17   :  { %p601_p8 = scmp.ne.s32.totalorder %s860_s0, %s600_s29  ;;  %p604_p9 = scmp.lt.u32.totalorder %s600_s29, %s860_s0 }
  0x19   :  { %p606_p10 = pnand %p604_p9, %p601_p8 }
  0x1b   :  { %609 = shalt.err (!%p606_p10)
}
  0x1c   :  { %s610_s1 = scalar_lea.vmem %s25_s24, 128  ;;  %p615_p12 = scmp.lt.s32.totalorder %s25_s24, %s25_s24 }
  0x1d   :  { %p611_p11 = scmp.ne.s32.totalorder %s25_s24, %s610_s1  ;;  %p616_p13 = scmp.lt.s32.totalorder %s610_s1, %s610_s1 }
  0x1f   :  { %p617_p0 = por %p616_p13, %p615_p12 }
  0x21   :  { %p618_p1 = pnand %p617_p0, %p611_p11 }
  0x23   :  { %621 = shalt.err (!%p618_p1)
}
  0x24   :  { %27 = dma.hbm_to_vmem [thread:$0]  %s860_s0, 128, %s25_s24, [#allocation3]  }
  0x25   :  { %s622_s17 = scalar_lea.hbm %s864_s4, 1024 }
  0x26   :  { %p623_p2 = scmp.ne.s32.totalorder %s864_s4, %s622_s17  ;;  %p626_p3 = scmp.lt.u32.totalorder %s622_s17, %s864_s4 }
  0x28   :  { %p628_p4 = pnand %p626_p3, %p623_p2 }
  0x2a   :  { %631 = shalt.err (!%p628_p4)
}
  0x2b   :  { %s632_s25 = scalar_lea.vmem %s50_s26, 1024  ;;  %p637_p6 = scmp.lt.s32.totalorder %s50_s26, %s50_s26 }
  0x2c   :  { %p633_p5 = scmp.ne.s32.totalorder %s50_s26, %s632_s25  ;;  %p638_p7 = scmp.lt.s32.totalorder %s632_s25, %s632_s25 }
  0x2e   :  { %p639_p8 = por %p638_p7, %p637_p6 }
  0x30   :  { %p640_p9 = pnand %p639_p8, %p633_p5 }
  0x32   :  { %643 = shalt.err (!%p640_p9)
}
  0x33   :  { %55 = dma.hbm_to_vmem [thread:$0]  %s864_s4, 1024, %s50_s26, [#allocation6], %s697_s19, %s697_s19, %s698_s20  }
  0x34   :  { %s701_s27 = smov [#allocation8]   ;;  %s644_s11 = scalar_lea.hbm %s867_s7, 1024 }
  0x35   :  { %s65_s28 = sshll.u32 %s701_s27, 4  ;;  %p645_p10 = scmp.ne.s32.totalorder %s867_s7, %s644_s11  ;;  %s66_s28 = int_to_ptr.vmem [resolvable:$true] %s65_s28 }
  0x36   :  { %p648_p11 = scmp.lt.u32.totalorder %s644_s11, %s867_s7 }
  0x38   :  { %p650_p12 = pnand %p648_p11, %p645_p10 }
  0x3a   :  { %653 = shalt.err (!%p650_p12)
}
  0x3b   :  { %s654_s14 = scalar_lea.vmem %s66_s28, 1024  ;;  %p659_p0 = scmp.lt.s32.totalorder %s66_s28, %s66_s28 }
  0x3c   :  { %p655_p13 = scmp.ne.s32.totalorder %s66_s28, %s654_s14  ;;  %p660_p1 = scmp.lt.s32.totalorder %s654_s14, %s654_s14 }
  0x3e   :  { %p661_p2 = por %p660_p1, %p659_p0 }
  0x40   :  { %p662_p3 = pnand %p661_p2, %p655_p13 }
  0x42   :  { %665 = shalt.err (!%p662_p3)
}
  0x43   :  { %71 = dma.hbm_to_vmem [thread:$0]  %s867_s7, 1024, %s66_s28, [#allocation9], %s697_s19, %s697_s19, %s698_s20  }
  0x44   :  { %688 = dma.done.wait [#allocation3], 128  }
  0x45   :  { %689 = vsyncadd [#allocation3], 4294967168 }
  0x46   :  { %690 = dma.done.wait [#allocation6], 1280  }
  0x47   :  { %691 = vsyncadd [#allocation6], 4294966016 }
  0x48   :  { %692 = dma.done.wait [#allocation9], 1024  }
  0x49   :  { %693 = vsyncadd [#allocation9], 4294966272  ;;  %v702_v0 = vmov 0.0   ;;  %vm703_vm0 = vmmov 0   ;;  %v556_v1 = vld [vmem:[#allocation5] sm:$0xff]   ;;  %v557_v2 = vld [vmem:[#allocation5 + $0x8] sm:$0xff]   ;;  %v170_v34 = vlaneseq }
  0x4a   :  { %499 = vmatprep.subr.bf16.mxu0 %v702_v0  ;;  %503 = vmatprep.mubr.msk.bf16.mxu0 %vm703_vm0, %v702_v0  ;;  %v87_v3 = vld [vmem:[#allocation2] sm:$0xff]  ;;  %vm105_vm1 = vcmask 261120   ;;  %v558_v5 = vld [vmem:[#allocation7] sm:$0xff]   ;;  %v560_v7 = vld [vmem:[#allocation7 + $0x10] sm:$0xff]   ;;  %s704_s22 = smov [#allocation10]  }
  0x4b   :  { %507 = vmatprep.subr.bf16.mxu1 %v702_v0  ;;  %523 = vmatprep.mubr.msk.bf16.mxu1 %vm703_vm0, %v702_v0  ;;  %v88_v4 = vpack.c.bf16 %v87_v3, %v87_v3  ;;  %v559_v6 = vld [vmem:[#allocation7 + $0x8] sm:$0xff]   ;;  %v561_v8 = vld [vmem:[#allocation7 + $0x18] sm:$0xff]   ;;  %v562_v9 = vld [vmem:[#allocation7 + $0x20] sm:$0xff]   ;;  %v171_v35 = vshrl.u32 %v170_v34, 7  ;;  %s445_s23 = sshll.u32 %s704_s22, 4  ;;  %s446_s23 = int_to_ptr.vmem [resolvable:$true] %s445_s23 }
  0x4c   :  { %500 = vmatpush3.bf16.msra.mxu0 %v556_v1  ;;  %508 = vmatpush3.bf16.msra.mxu1 %v558_v5  ;;  %v563_v10 = vld [vmem:[#allocation7 + $0x28] sm:$0xff]   ;;  %v564_v11 = vld [vmem:[#allocation7 + $0x30] sm:$0xff]   ;;  %v565_v12 = vld [vmem:[#allocation7 + $0x38] sm:$0xff]   ;;  %p671_p5 = scmp.lt.s32.totalorder %s446_s23, %s446_s23 }
  0x4d   :  { %501 = vmatprep.subr.bf16.mxu0 %v702_v0  ;;  %509 = vmatprep.subr.bf16.mxu1 %v702_v0  ;;  %v165_v36 = vld [vmem:[%s862_s2] sm:$0x1]  ;;  %v172_v37 = vsub.s32 0, %v171_v35  ;;  %v566_v46 = vld [vmem:[#allocation8] sm:$0xff]   ;;  %v568_v48 = vld [vmem:[#allocation8 + $0x10] sm:$0xff]  }
  0x4e   :  { %v459_v41 = vld [vmem:[%s863_s3] ss:$0 sm:$0xff]  ;;  %v569_v49 = vld [vmem:[#allocation8 + $0x18] sm:$0xff]   ;;  %v570_v50 = vld [vmem:[#allocation8 + $0x20] sm:$0xff]  }
  0x4f   :  { %v567_v47 = vld [vmem:[#allocation8 + $0x8] sm:$0xff]   ;;  %v572_v52 = vld [vmem:[#allocation8 + $0x30] sm:$0xff]   ;;  %v573_v53 = vld [vmem:[#allocation8 + $0x38] sm:$0xff]  }
  0x50   :  { %502 = vmatpush3.bf16.msra.mxu0 %v557_v2  ;;  %510 = vmatpush3.bf16.msra.mxu1 %v559_v6  ;;  %v571_v51 = vld [vmem:[#allocation8 + $0x28] sm:$0xff]  }
  0x51   :  { %527 = vmatprep.subr.bf16.mxu0 %v702_v0  ;;  %511 = vmatprep.subr.bf16.mxu1 %v702_v0 }
  0x53   :  { %504 = vmatmul.mubr.msk.bf16.vlgmr.msra.gmra.mrb[0].mxu0 %vm105_vm1, %v88_v4 }
  0x54   :  { %543 = vmatprep.mubr.msk.bf16.mxu0 %vm703_vm0, %v702_v0  ;;  %512 = vmatpush3.bf16.msra.mxu1 %v560_v7 }
  0x55   :  { %513 = vmatprep.subr.bf16.mxu1 %v702_v0  ;;  %528 = vmatpush3.bf16.msra.mxu0 %v566_v46 }
  0x56   :  { %529 = vmatprep.subr.bf16.mxu0 %v702_v0 }
  0x58   :  { %514 = vmatpush3.bf16.msra.mxu1 %v561_v8 }
  0x59   :  { %515 = vmatprep.subr.bf16.mxu1 %v702_v0  ;;  %530 = vmatpush3.bf16.msra.mxu0 %v567_v47 }
  0x5a   :  { %531 = vmatprep.subr.bf16.mxu0 %v702_v0 }
  0x5c   :  { %516 = vmatpush3.bf16.msra.mxu1 %v562_v9 }
  0x5d   :  { %517 = vmatprep.subr.bf16.mxu1 %v702_v0  ;;  %532 = vmatpush3.bf16.msra.mxu0 %v568_v48 }
  0x5e   :  { %533 = vmatprep.subr.bf16.mxu0 %v702_v0 }
  0x60   :  { %518 = vmatpush3.bf16.msra.mxu1 %v563_v10 }
  0x61   :  { %519 = vmatprep.subr.bf16.mxu1 %v702_v0  ;;  %534 = vmatpush3.bf16.msra.mxu0 %v569_v49 }
  0x62   :  { %535 = vmatprep.subr.bf16.mxu0 %v702_v0 }
  0x64   :  { %520 = vmatpush3.bf16.msra.mxu1 %v564_v11  ;;  %v306_v11 = vld [vmem:[%s865_s5] sm:$0x1]  ;;  %s666_s5 = scalar_lea.vmem %s446_s23, 128 }
  0x65   :  { %521 = vmatprep.subr.bf16.mxu1 %v702_v0  ;;  %536 = vmatpush3.bf16.msra.mxu0 %v570_v50  ;;  %p667_p4 = scmp.ne.s32.totalorder %s446_s23, %s666_s5  ;;  %p672_p6 = scmp.lt.s32.totalorder %s666_s5, %s666_s5 }
  0x66   :  { %537 = vmatprep.subr.bf16.mxu0 %v702_v0 }
  0x67   :  { %p673_p7 = por %p672_p6, %p671_p5 }
  0x68   :  { %522 = vmatpush3.bf16.msra.mxu1 %v565_v12 }
  0x69   :  { %538 = vmatpush3.bf16.msra.mxu0 %v571_v51  ;;  %p674_p8 = pnand %p673_p7, %p667_p4 }
  0x6a   :  { %539 = vmatprep.subr.bf16.mxu0 %v702_v0 }
  0x6d   :  { %540 = vmatpush3.bf16.msra.mxu0 %v572_v52 }
  0x6e   :  { %541 = vmatprep.subr.bf16.mxu0 %v702_v0 }
  0x71   :  { %542 = vmatpush3.bf16.msra.mxu0 %v573_v53 }
 0x126   :  { %v143_v13 = vpop.f32.mrb[0].mxu0 }
 0x127   :  { %v149_v14 = vrot.slane %v143_v13, 4  ;;  %v505_v15 = vpop.f32.mrb[1].mxu0 }
 0x128   :  { %v146_v16 = vpop.f32.mrb[2].mxu0  ;;  %v468_v15 = vld [vmem:[%s866_s6] ss:$0 sm:$0xff] }
 0x129   :  { %v150_v17 = vadd.f32 %v149_v14, %v143_v13  ;;  %v506_v18 = vpop.f32.mrb[3].mxu0 }
 0x12b   :  { %v151_v19 = vrot.slane %v150_v17, 2 }
 0x12d   :  { %v152_v20 = vadd.f32 %v151_v19, %v150_v17 }
 0x12f   :  { %v153_v21 = vrot.slane %v152_v20, 1 }
 0x131   :  { %v154_v22 = vadd.f32 %v153_v21, %v152_v20  ;;  %v469_v20 = vld [vmem:[%s868_s8] ss:$0 sm:$0xff] }
 0x133   :  { %v155_v23 = vmul.f32 0.125, %v154_v22 }
 0x135   :  { %v156_v24 = vsub.f32 %v143_v13, %v155_v23 }
 0x137   :  { %v157_v25 = vmul.f32 %v156_v24, %v156_v24 }
 0x139   :  { %v158_v26 = vrot.slane %v157_v25, 4 }
 0x13b   :  { %v159_v27 = vadd.f32 %v158_v26, %v157_v25 }
 0x13d   :  { %v160_v28 = vrot.slane %v159_v27, 2 }
 0x13f   :  { %v161_v29 = vadd.f32 %v160_v28, %v159_v27 }
 0x141   :  { %v162_v30 = vrot.slane %v161_v29, 1 }
 0x143   :  { %v163_v31 = vadd.f32 %v162_v30, %v161_v29 }
 0x145   :  { %v164_v32 = vmul.f32 0.125, %v163_v31 }
 0x147   :  { %v166_v33 = vadd.f32 1e-05, %v164_v32 }
 0x149   :  { %574 = vrsqrt.f32 %v166_v33 }
 0x153   :  { %v575_v38 = vpop.eup %574 }
 0x154   :  { %v168_v39 = vmul.f32 %v575_v38, %v165_v36 }
 0x156   :  { %v173_v40 = vrot.slane %v168_v39, %v172_v37 }
 0x158   :  { %v175_v42 = vmul.f32 %v173_v40, %v156_v24 }
 0x15a   :  { %v183_v43 = vadd.f32 %v459_v41, %v175_v42 }
 0x15c   :  { %v184_v44 = vmax.f32 %v183_v43, 0.0 }
 0x15e   :  { %v185_v45 = vpack.c.bf16 %v184_v44, %v184_v44 }
 0x160   :  { %524 = vmatmul.mubr.bf16.vlgmr.msra.gmra.mrb[0].mxu1 %v185_v45 }
 0x233   :  { %v284_v54 = vpop.f32.mrb[0].mxu1 }
 0x234   :  { %v290_v55 = vrot.slane %v284_v54, 4  ;;  %v525_v56 = vpop.f32.mrb[1].mxu1 }
 0x235   :  { %v287_v57 = vpop.f32.mrb[2].mxu1 }
 0x236   :  { %v291_v58 = vadd.f32 %v290_v55, %v284_v54  ;;  %v526_v59 = vpop.f32.mrb[3].mxu1 }
 0x238   :  { %v292_v60 = vrot.slane %v291_v58, 2 }
 0x23a   :  { %v293_v61 = vadd.f32 %v292_v60, %v291_v58 }
 0x23c   :  { %v294_v62 = vrot.slane %v293_v61, 1 }
 0x23e   :  { %v295_v63 = vadd.f32 %v294_v62, %v293_v61 }
 0x240   :  { %v296_v1 = vmul.f32 0.125, %v295_v63 }
 0x242   :  { %v297_v2 = vsub.f32 %v284_v54, %v296_v1 }
 0x244   :  { %v298_v3 = vmul.f32 %v297_v2, %v297_v2 }
 0x246   :  { %v299_v4 = vrot.slane %v298_v3, 4 }
 0x248   :  { %v300_v5 = vadd.f32 %v299_v4, %v298_v3 }
 0x24a   :  { %v301_v6 = vrot.slane %v300_v5, 2 }
 0x24c   :  { %v302_v7 = vadd.f32 %v301_v6, %v300_v5 }
 0x24e   :  { %v303_v0 = vrot.slane %v302_v7, 1 }
 0x250   :  { %v304_v8 = vadd.f32 %v303_v0, %v302_v7 }
 0x252   :  { %v305_v9 = vmul.f32 0.125, %v304_v8 }
 0x254   :  { %v307_v10 = vadd.f32 1e-05, %v305_v9 }
 0x256   :  { %576 = vrsqrt.f32 %v307_v10 }
 0x260   :  { %v577_v12 = vpop.eup %576 }
 0x261   :  { %v309_v13 = vmul.f32 %v577_v12, %v306_v11 }
 0x263   :  { %v314_v14 = vrot.slane %v309_v13, %v172_v37 }
 0x265   :  { %v316_v16 = vmul.f32 %v314_v14, %v297_v2 }
 0x267   :  { %v324_v17 = vadd.f32 %v468_v15, %v316_v16 }
 0x269   :  { %v325_v18 = vmax.f32 %v324_v17, 0.0 }
 0x26b   :  { %v326_v19 = vpack.c.bf16 %v325_v18, %v325_v18 }
 0x26d   :  { %544 = vmatmul.mubr.bf16.vlgmr.msra.gmra.mrb[4].mxu0 %v326_v19 }
 0x340   :  { %v432_v21 = vpop.f32.mrb[4].mxu0 }
 0x341   :  { %v433_v22 = vadd.f32 %v469_v20, %v432_v21  ;;  %v545_v23 = vpop.f32.mrb[5].mxu0 }
 0x342   :  { %v435_v24 = vpop.f32.mrb[6].mxu0 }
 0x343   :  { %438 = vst [vmem:[#allocation10] sm:$0xff] %v433_v22  ;;  %v546_v25 = vpop.f32.mrb[7].mxu0 }
 0x344   :  { %677 = shalt.err (!%p674_p8)
}
 0x345   :  { %s678_s8 = scalar_lea.hbm %s869_s9, 128 }
 0x346   :  { %p679_p9 = scmp.ne.s32.totalorder %s869_s9, %s678_s8  ;;  %p682_p10 = scmp.lt.u32.totalorder %s678_s8, %s869_s9 }
 0x348   :  { %p684_p11 = pnand %p682_p10, %p679_p9 }
 0x34a   :  { %687 = shalt.err (!%p684_p11)
}
 0x34b   :  { %448 = dma.vmem_to_hbm [thread:$0]  %s446_s23, 128, %s869_s9, [#allocation4]  }
 0x34c   :  { %694 = dma.done.wait [#allocation4], 128  }
 0x34d   :  { %695 = vsyncadd [#allocation4], 4294967168 }
 0x34e   :  { %452 = vsyncpa [#allocation3], 1 }
 0x34f   :  { %453 = vsyncpa [#allocation6], 1 }
 0x350   :  { %454 = vsyncpa [#allocation9], 1 }
 0x351   :  { %455 = vsyncpa [#allocation4], 1 }

</bundles_post_ra>
